<compile_context>
chip_gen: v5e
topology: v5e:2x2
jax: 0.10.0
libtpu: 0.0.40
codegen_flags: <defaults>
</compile_context>

<pallas_src>
import jax
import jax.numpy as jnp
from jax import lax
from jax.experimental import pallas as pl
from jax.experimental.pallas import tpu as pltpu


def _round_up(x, m):
    return ((x + m - 1) // m) * m


def _generate_node_kernel(lbl_ref, ne_ref, cc_ref, wne_ref, wcc_ref,
                          embw_ref, embp_ref, out_ref):
    # lbl_ref : [B, 1]       int32 label ids
    # ne_ref  : [B, H]       node embedding
    # cc_ref  : [B, H]       current context
    # wne_ref : [H, 4H]      W rows for node_embedding (sigmoid cols * 0.5)
    # wcc_ref : [H, 4H]      W rows for current_context (sigmoid cols * 0.5)
    # embw_ref: [OP, 4H]     emb_table @ W[2H:] + b   (sigmoid cols * 0.5)
    # embp_ref: [OP, SW]     raw emb_table packed in columns [0, E)
    # out_ref : [B, 2H+SW]   lanes [0,2H) = [l | r], lanes [2H,2H+E) = emb
    B, H = ne_ref.shape
    OP = embw_ref.shape[0]
    TH = wne_ref.shape[1] // 2  # 2H

    # ---- fused embedding gather: one-hot @ table on the MXU (exact) ----
    lbl = lbl_ref[...]                                           # [B, 1]
    onehot = (lax.broadcasted_iota(jnp.int32, (B, OP), 1)
              == lbl).astype(jnp.float32)                        # [B, OP]

    # ---- concat-free fused linear (bias + 0.5 pre-scale folded in embw) ----
    z = jnp.dot(ne_ref[...], wne_ref[...],
                preferred_element_type=jnp.float32)
    z = z + jnp.dot(cc_ref[...], wcc_ref[...],
                    preferred_element_type=jnp.float32)
    z = z + jnp.dot(onehot, embw_ref[...],
                    preferred_element_type=jnp.float32)          # [B, 4H]

    # ---- single-tanh gating: sigmoid(x) = 0.5*tanh(x/2) + 0.5 ----
    t = jnp.tanh(z)                                              # one EUP pass
    g = t[:, :TH] * (t[:, TH:] * 0.5 + 0.5)                      # [B, 2H] = [l|r]

    # ---- raw embedding (node_label_) rides in the same output tile ----
    nl = jnp.dot(onehot, embp_ref[...],
                 preferred_element_type=jnp.float32)             # [B, SW]

    out_ref[...] = jnp.concatenate([g, nl], axis=1).astype(out_ref.dtype)


def prepare_generate_node_params(params):
    """One-time restacking of the module parameters for the fused kernel."""
    emb = params["embeddings"].astype(jnp.float32)   # [OP, E]
    w = params["w_stacked"].astype(jnp.float32)      # [2H+E, 4H] = [W_l|W_r|W_lg|W_rg]
    b = params["b_stacked"].astype(jnp.float32)      # [1, 4H]
    OP, E = emb.shape
    FH = w.shape[1]
    H = FH // 4
    TH = 2 * H

    # Fold the 0.5 pre-scale of the sigmoid halves into weights + bias.
    col_scale = jnp.concatenate(
        [jnp.ones((TH,), jnp.float32), jnp.full((TH,), 0.5, jnp.float32)])
    w_s = w * col_scale[None, :]
    b_s = b * col_scale[None, :]

    wne = w_s[0:H, :]                                 # [H, 4H]
    wcc = w_s[H:2 * H, :]                             # [H, 4H]
    # Embedding projection + bias folded into a tiny [OP, 4H] table (a one-hot
    # row selects exactly one table row, so adding b per row == adding b once).
    embw = emb @ w_s[2 * H:, :] + b_s                 # [OP, 4H]

    # Raw embedding packed into a lane slab (node_label_ output).
    slab_w = max(TH, E)
    embp = jnp.zeros((OP, slab_w), jnp.float32).at[:, :E].set(emb)

    return {"wne": wne, "wcc": wcc, "embw": embw, "embp": embp,
            "hidden_size": H, "embedding_size": E}


def generate_node_forward(node_embedding, node_label, current_context, prep,
                          *, block_b=8192):
    """JAX wrapper reproducing GenerateNode.forward (eval mode).

    node_embedding : [B, 1, H] float32
    node_label     : [B]       int32
    current_context: [B, 1, H] float32
    Returns (l_child [B, H], r_child [B, H], node_label_ [B, E]).
    """
    H = prep["hidden_size"]
    E = prep["embedding_size"]
    wne, wcc, embw, embp = prep["wne"], prep["wcc"], prep["embw"], prep["embp"]
    OP, FH = embw.shape
    TH = 2 * H
    slab_w = embp.shape[1]
    OUTW = TH + slab_w

    # Size-1 squeezes / reshape are metadata-only (zero-copy) in XLA.
    ne = node_embedding[:, 0, :]                                  # [B, H]
    cc = current_context[:, 0, :]                                 # [B, H]
    lbl = node_label.reshape(-1, 1).astype(jnp.int32)             # [B, 1]
    B = ne.shape[0]
    out_dtype = ne.dtype

    # TODO(synk): training-mode dropout not implemented (eval-mode identity).

    MEGACORE_MIN = 1024   # below this, per-step grid overhead > megacore gain
    if B <= MEGACORE_MIN and B <= block_b:
        # Small batch: gridless, whole arrays resident in VMEM.
        vmem = pl.BlockSpec(memory_space=pltpu.MemorySpace.VMEM)
        out = pl.pallas_call(
            _generate_node_kernel,
            out_shape=jax.ShapeDtypeStruct((B, OUTW), out_dtype),
            in_specs=[vmem] * 7,
            out_specs=vmem,
        )(lbl, ne, cc, wne, wcc, embw, embp)
    else:
        # Large batch: >= 2 blocks on a "parallel" axis (v7x megacore), each
        # block as large as the VMEM budget allows (default 8192 rows ~ 12 MiB
        # double-buffered, safe under the 32 MiB scoped default on all chips).
        bb = min(block_b, _round_up(pl.cdiv(B, 2), 8))
        nb = pl.cdiv(B, bb)
        Bp = nb * bb
        if Bp != B:
            pad = Bp - B
            ne = jnp.pad(ne, ((0, pad), (0, 0)))
            cc = jnp.pad(cc, ((0, pad), (0, 0)))
            lbl = jnp.pad(lbl, ((0, pad), (0, 0)))   # label 0 is a valid index
        out = pl.pallas_call(
            _generate_node_kernel,
            out_shape=jax.ShapeDtypeStruct((Bp, OUTW), out_dtype),
            grid=(nb,),
            in_specs=[
                pl.BlockSpec((bb, 1), lambda i: (i, 0)),
                pl.BlockSpec((bb, H), lambda i: (i, 0)),
                pl.BlockSpec((bb, H), lambda i: (i, 0)),
                # Constant-index operands: fetched once, not re-DMA'd per step.
                pl.BlockSpec((H, FH), lambda i: (0, 0)),
                pl.BlockSpec((H, FH), lambda i: (0, 0)),
                pl.BlockSpec((OP, FH), lambda i: (0, 0)),
                pl.BlockSpec((OP, slab_w), lambda i: (0, 0)),
            ],
            out_specs=pl.BlockSpec((bb, OUTW), lambda i: (i, 0)),
            compiler_params=pltpu.CompilerParams(
                dimension_semantics=("parallel",)),
        )(lbl, ne, cc, wne, wcc, embw, embp)
        out = out[:B]

    l_child = out[:, :H]
    r_child = out[:, H:TH]
    node_label_ = out[:, TH:TH + E]
    return l_child, r_child, node_label_


def init_params(key, hidden_size, op_nums, embedding_size):
    """Deterministic synthetic parameter init (shapes match the nn.Module)."""
    k_emb, k_wl, k_wr, k_wlg, k_wrg, k_b = jax.random.split(key, 6)
    in_dim = hidden_size * 2 + embedding_size

    def lin_w(k):
        return jax.random.normal(k, (in_dim, hidden_size), jnp.float32) * 0.05

    w_l, w_r, w_lg, w_rg = lin_w(k_wl), lin_w(k_wr), lin_w(k_wlg), lin_w(k_wrg)
    b_all = jax.random.normal(k_b, (1, 4 * hidden_size), jnp.float32) * 0.01

    return {
        "embeddings": jax.random.normal(
            k_emb, (op_nums, embedding_size), jnp.float32) * 0.1,
        # column order: [W_l | W_r | W_lg | W_rg]
        "w_stacked": jnp.concatenate([w_l, w_r, w_lg, w_rg], axis=1),
        "b_stacked": b_all,
    }


def _reference(node_embedding, node_label, current_context, params, H):
    """Pure-JAX reference (matches PyTorch GenerateNode in eval mode)."""
    emb = jnp.take(params["embeddings"], node_label, axis=0)
    x = jnp.concatenate(
        [node_embedding[:, 0], current_context[:, 0], emb], axis=1)
    z = x @ params["w_stacked"] + params["b_stacked"]
    # column order [W_l | W_r | W_lg | W_rg]
    l = jnp.tanh(z[:, 0 * H:1 * H]) * jax.nn.sigmoid(z[:, 2 * H:3 * H])
    r = jnp.tanh(z[:, 1 * H:2 * H]) * jax.nn.sigmoid(z[:, 3 * H:4 * H])
    return l, r, emb


if __name__ == "__main__":
    hidden_size = 32
    embedding_size = 32
    op_nums = 10

    key = jax.random.PRNGKey(0)
    k_params, k_data = jax.random.split(key)
    params = init_params(k_params, hidden_size, op_nums, embedding_size)
    prep = prepare_generate_node_params(params)

    # ---- small-batch case (gridless path), matches module usage ----
    B = 8
    k_ne, k_cc, k_lbl, k_ne2, k_cc2, k_lbl2 = jax.random.split(k_data, 6)
    node_embedding = jax.random.normal(k_ne, (B, 1, hidden_size), jnp.float32)
    current_context = jax.random.normal(k_cc, (B, 1, hidden_size), jnp.float32)
    node_label = jax.random.randint(k_lbl, (B,), 0, op_nums, dtype=jnp.int32)

    l_child, r_child, node_label_ = generate_node_forward(
        node_embedding, node_label, current_context, prep)
    jax.block_until_ready((l_child, r_child, node_label_))

    l_ref, r_ref, emb_ref = _reference(
        node_embedding, node_label, current_context, params, hidden_size)
    assert jnp.allclose(l_child, l_ref, atol=1e-4)
    assert jnp.allclose(r_child, r_ref, atol=1e-4)
    assert jnp.allclose(node_label_, emb_ref, atol=1e-5)

    # ---- larger batch exercising the tiled "parallel" grid + padding path ----
    B2 = 1500   # not a multiple of the tile: exercises cdiv grid + zero pad
    ne2 = jax.random.normal(k_ne2, (B2, 1, hidden_size), jnp.float32)
    cc2 = jax.random.normal(k_cc2, (B2, 1, hidden_size), jnp.float32)
    lbl2 = jax.random.randint(k_lbl2, (B2,), 0, op_nums, dtype=jnp.int32)

    l2, r2, nl2 = generate_node_forward(ne2, lbl2, cc2, prep)
    jax.block_until_ready((l2, r2, nl2))

    l2_ref, r2_ref, emb2_ref = _reference(ne2, lbl2, cc2, params, hidden_size)
    assert jnp.allclose(l2, l2_ref, atol=1e-4)
    assert jnp.allclose(r2, r2_ref, atol=1e-4)
    assert jnp.allclose(nl2, emb2_ref, atol=1e-5)

    print("KERNEL_OK")
</pallas_src>

<mosaic_0001>
module attributes {stable_mosaic.version = 11 : i64} {
  func.func @_generate_node_kernel(%arg0: memref<8x1xi32, #tpu.memory_space<vmem>>, %arg1: memref<8x32xf32, #tpu.memory_space<vmem>>, %arg2: memref<8x32xf32, #tpu.memory_space<vmem>>, %arg3: memref<32x128xf32, #tpu.memory_space<vmem>>, %arg4: memref<32x128xf32, #tpu.memory_space<vmem>>, %arg5: memref<10x128xf32, #tpu.memory_space<vmem>>, %arg6: memref<10x64xf32, #tpu.memory_space<vmem>>, %arg7: memref<8x128xf32, #tpu.memory_space<vmem>>) attributes {dimension_semantics = [], scalar_prefetch = 0 : i64, scratch_operands = 0 : i64, tpu.core_type = #tpu.core_type<tc>} {
    %c0 = arith.constant 0 : index
    %c0_0 = arith.constant 0 : index
    %0 = vector.load %arg0[%c0, %c0_0] : memref<8x1xi32, #tpu.memory_space<vmem>>, vector<8x1xi32>
    %1 = tpu.iota {dimensions = array<i32: 1>} : vector<8x10xi32>
    %2 = vector.broadcast %0 : vector<8x1xi32> to vector<8x10xi32>
    %3 = arith.cmpi eq, %1, %2 : vector<8x10xi32>
    %4 = arith.extui %3 : vector<8x10xi1> to vector<8x10xi32>
    %5 = arith.sitofp %4 : vector<8x10xi32> to vector<8x10xf32>
    %c0_1 = arith.constant 0 : index
    %c0_2 = arith.constant 0 : index
    %6 = vector.load %arg1[%c0_1, %c0_2] : memref<8x32xf32, #tpu.memory_space<vmem>>, vector<8x32xf32>
    %c0_3 = arith.constant 0 : index
    %c0_4 = arith.constant 0 : index
    %7 = vector.load %arg3[%c0_3, %c0_4] : memref<32x128xf32, #tpu.memory_space<vmem>>, vector<32x128xf32>
    %cst = arith.constant dense<0.000000e+00> : vector<8x128xf32>
    %8 = tpu.matmul %6, %7, %cst {dimension_numbers = #tpu.dot_dimension_numbers<[1], [0], [0], [1], [0, 0, 1, 1], [], []>} : vector<8x32xf32>, vector<32x128xf32>, vector<8x128xf32> -> vector<8x128xf32>
    %c0_5 = arith.constant 0 : index
    %c0_6 = arith.constant 0 : index
    %9 = vector.load %arg2[%c0_5, %c0_6] : memref<8x32xf32, #tpu.memory_space<vmem>>, vector<8x32xf32>
    %c0_7 = arith.constant 0 : index
    %c0_8 = arith.constant 0 : index
    %10 = vector.load %arg4[%c0_7, %c0_8] : memref<32x128xf32, #tpu.memory_space<vmem>>, vector<32x128xf32>
    %cst_9 = arith.constant dense<0.000000e+00> : vector<8x128xf32>
    %11 = tpu.matmul %9, %10, %cst_9 {dimension_numbers = #tpu.dot_dimension_numbers<[1], [0], [0], [1], [0, 0, 1, 1], [], []>} : vector<8x32xf32>, vector<32x128xf32>, vector<8x128xf32> -> vector<8x128xf32>
    %12 = arith.addf %8, %11 : vector<8x128xf32>
    %c0_10 = arith.constant 0 : index
    %c0_11 = arith.constant 0 : index
    %13 = vector.load %arg5[%c0_10, %c0_11] : memref<10x128xf32, #tpu.memory_space<vmem>>, vector<10x128xf32>
    %cst_12 = arith.constant dense<0.000000e+00> : vector<8x128xf32>
    %14 = tpu.matmul %5, %13, %cst_12 {dimension_numbers = #tpu.dot_dimension_numbers<[1], [0], [0], [1], [0, 0, 1, 1], [], []>} : vector<8x10xf32>, vector<10x128xf32>, vector<8x128xf32> -> vector<8x128xf32>
    %15 = arith.addf %12, %14 : vector<8x128xf32>
    %16 = math.tanh %15 : vector<8x128xf32>
    %17 = vector.extract_strided_slice %16 {offsets = [0, 0], sizes = [8, 64], strides = [1, 1]} : vector<8x128xf32> to vector<8x64xf32>
    %18 = vector.extract_strided_slice %16 {offsets = [0, 64], sizes = [8, 64], strides = [1, 1]} : vector<8x128xf32> to vector<8x64xf32>
    %cst_13 = arith.constant 5.000000e-01 : f32
    %19 = vector.broadcast %cst_13 : f32 to vector<8x64xf32>
    %20 = arith.mulf %18, %19 : vector<8x64xf32>
    %cst_14 = arith.constant 5.000000e-01 : f32
    %21 = vector.broadcast %cst_14 : f32 to vector<8x64xf32>
    %22 = arith.addf %20, %21 : vector<8x64xf32>
    %23 = arith.mulf %17, %22 : vector<8x64xf32>
    %c0_15 = arith.constant 0 : index
    %c0_16 = arith.constant 0 : index
    %24 = vector.load %arg6[%c0_15, %c0_16] : memref<10x64xf32, #tpu.memory_space<vmem>>, vector<10x64xf32>
    %cst_17 = arith.constant dense<0.000000e+00> : vector<8x64xf32>
    %25 = tpu.matmul %5, %24, %cst_17 {dimension_numbers = #tpu.dot_dimension_numbers<[1], [0], [0], [1], [0, 0, 1, 1], [], []>} : vector<8x10xf32>, vector<10x64xf32>, vector<8x64xf32> -> vector<8x64xf32>
    %26 = tpu.concatenate %23, %25 in 1 : vector<8x64xf32>, vector<8x64xf32> -> vector<8x128xf32>
    %c0_18 = arith.constant 0 : index
    %c0_19 = arith.constant 0 : index
    %27 = vector.load %arg7[%c0_18, %c0_19] : memref<8x128xf32, #tpu.memory_space<vmem>>, vector<8x128xf32>
    tpu.vector_store %arg7[%c0_18, %c0_19], %26 {strides = array<i32>} : memref<8x128xf32, #tpu.memory_space<vmem>>, vector<8x128xf32>,
    return
  }
}

</mosaic_0001>

<bundles_post_ra>
// kernel: tpu_custom_call.1
= control target key start
LH: loop header
LB: loop body
LE: loop exit
PB: predicated region body
PF: predicated region fallthrough
CT: control target
= control target key end

     0   :  { %12 = vsyncpa [#allocation3], 0  ;;  %s507_s0 = inlined_call_operand.vmem [shape: s32[8,1], index: 0, kind: input, shape index: {}]   ;;  %s508_s1 = inlined_call_operand.vmem [shape: f32[8,32], index: 1, kind: input, shape index: {}]   ;;  %s509_s2 = inlined_call_operand.hbm [shape: f32[8,32], index: 2, kind: input, shape index: {}]   ;;  %s510_s3 = inlined_call_operand.hbm [shape: f32[32,128], index: 3, kind: input, shape index: {}]   ;;  %s511_s4 = inlined_call_operand.hbm [shape: f32[32,128], index: 4, kind: input, shape index: {}]   ;;  %s512_s5 = inlined_call_operand.hbm [shape: f32[10,128], index: 5, kind: input, shape index: {}]   ;;  %s513_s6 = inlined_call_operand.hbm [shape: f32[10,64], index: 6, kind: input, shape index: {}]   ;;  %s514_s7 = inlined_call_operand.hbm [shape: f32[8,128], index: 7, kind: output, shape index: {}]  }
   0x1   :  { %13 = vsyncpa [#allocation6], 0 }
   0x2   :  { %14 = vsyncpa [#allocation9], 0  ;;  %s35_s26 = sshll.u32 %s510_s3, 4  ;;  %s36_s26 = int_to_ptr.hbm [resolvable:$true] %s35_s26 }
   0x3   :  { %15 = vsyncpa [#allocation4], 0  ;;  %s432_s27 = smov [#allocation5]   ;;  %s61_s8 = sshll.u32 %s512_s5, 4  ;;  %s62_s8 = int_to_ptr.hbm [resolvable:$true] %s61_s8 }
   0x4   :  { %s37_s28 = sshll.u32 %s432_s27, 4  ;;  %s433_s9 = smov 128   ;;  %s38_s28 = int_to_ptr.vmem [resolvable:$true] %s37_s28 }
   0x5   :  { %s434_s10 = smov 8   ;;  %s435_s11 = smov [#allocation8]  }
   0x6   :  { %43 = dma.hbm_to_vmem [thread:$0]  %s36_s26, 512, %s38_s28, [#allocation6], %s433_s9, %s433_s9, %s434_s10  }
   0x7   :  { %s63_s12 = sshll.u32 %s435_s11, 4  ;;  %s25_s15 = sshll.u32 %s509_s2, 4  ;;  %s64_s12 = int_to_ptr.vmem [resolvable:$true] %s63_s12  ;;  %s26_s15 = int_to_ptr.hbm [resolvable:$true] %s25_s15 }
   0x8   :  { %69 = dma.hbm_to_vmem [thread:$0]  %s62_s8, 256, %s64_s12, [#allocation9], %s433_s9, %s433_s9, %s434_s10  }
   0x9   :  { %s48_s17 = sshll.u32 %s511_s4, 4  ;;  %s436_s18 = smov [#allocation2]   ;;  %s49_s17 = int_to_ptr.hbm [resolvable:$true] %s48_s17 }
   0xa   :  { %s27_s19 = sshll.u32 %s436_s18, 4  ;;  %s437_s5 = smov [#allocation7]   ;;  %s28_s19 = int_to_ptr.vmem [resolvable:$true] %s27_s19 }
   0xb   :  { %30 = dma.hbm_to_vmem [thread:$0]  %s26_s15, 128, %s28_s19, [#allocation3]  }
   0xc   :  { %s50_s20 = sshll.u32 %s437_s5, 4  ;;  %s74_s23 = sshll.u32 %s513_s6, 4  ;;  %s51_s20 = int_to_ptr.vmem [resolvable:$true] %s50_s20  ;;  %s75_s23 = int_to_ptr.hbm [resolvable:$true] %s74_s23 }
   0xd   :  { %56 = dma.hbm_to_vmem [thread:$0]  %s49_s17, 512, %s51_s20, [#allocation6], %s433_s9, %s433_s9, %s434_s10  }
   0xe   :  { %s438_s2 = smov [#allocation10]  }
   0xf   :  { %s76_s24 = sshll.u32 %s438_s2, 4  ;;  %s77_s24 = int_to_ptr.vmem [resolvable:$true] %s76_s24 }
  0x10   :  { %82 = dma.hbm_to_vmem [thread:$0]  %s75_s23, 256, %s77_s24, [#allocation9], %s433_s9, %s433_s9, %s434_s10  }
  0x11   :  { %424 = dma.done.wait [#allocation3], 128  }
  0x12   :  { %425 = vsyncadd [#allocation3], 4294967168 }
  0x13   :  { %426 = dma.done.wait [#allocation6], 1024  }
  0x14   :  { %427 = vsyncadd [#allocation6], 4294966272 }
  0x15   :  { %428 = dma.done.wait [#allocation9], 512  }
  0x16   :  { %429 = vsyncadd [#allocation9], 4294966784  ;;  %v439_v0 = vmov 0   ;;  %vm175_vm0 = vcmask 1041408   ;;  %v103_v1 = vld [vmem:[%s507_s0] sm:$0xff]  ;;  %v120_v6 = vld [vmem:[#allocation7 + $0x10] sm:$0xff]  ;;  %v104_v16 = vlaneseq }
  0x17   :  { %277 = vset.pattern.permute.xlu0 %v439_v0  ;;  %v121_v2 = vld [vmem:[#allocation7 + $0x18] sm:$0xff]  ;;  %v170_v4 = vld [vmem:[#allocation8 + $0x8] sm:$0x3]  ;;  %v115_v7 = vld [vmem:[#allocation5 + $0x10] sm:$0xff]  ;;  %vm122_vm1 = vcmask 261120   ;;  %vm171_vm2 = vcmask 80896  }
  0x18   :  { %v116_v3 = vld [vmem:[#allocation5 + $0x18] sm:$0xff]  ;;  %107 = vperm.xlu0 %277, %v103_v1   ;;  %138 = vmatpush.msra.mxu0 %v121_v2  ;;  %v169_v8 = vld [vmem:[#allocation8] sm:$0xff]  ;;  %v208_v9 = vld [vmem:[#allocation10] sm:$0xff]  ;;  %v105_v17 = vand.u32 127, %v104_v16  ;;  %v440_v19 = vmov 0.0   ;;  %s442_s26 = smov [#allocation11]  }
  0x19   :  { %v209_v5 = vld [vmem:[#allocation10 + $0x8] sm:$0x3]  ;;  %161 = vmatpush.msra.mxu1 %v116_v3  ;;  %262 = vmatpush.msk.msra.mxu2 %vm175_vm0, %v170_v4  ;;  %v119_v10 = vld [vmem:[#allocation7 + $0x8] sm:$0xff]  ;;  %v118_v12 = vld [vmem:[#allocation7] sm:$0xff]  ;;  %s245_s27 = sshll.u32 %s442_s26, 4  ;;  %s247_s30 = sshll.u32 %s514_s7, 4  ;;  %s246_s27 = int_to_ptr.vmem [resolvable:$true] %s245_s27  ;;  %s248_s30 = int_to_ptr.hbm [resolvable:$true] %s247_s30 }
  0x1a   :  { %264 = vmatpush.msk.msra.mxu3 %vm175_vm0, %v209_v5  ;;  %139 = vmatpush.msra.mxu0 %v120_v6  ;;  %v114_v11 = vld [vmem:[#allocation5 + $0x8] sm:$0xff]  ;;  %v113_v13 = vld [vmem:[#allocation5] sm:$0xff]  ;;  %v117_v14 = vld [vmem:[#allocation2] sm:$0xff]  ;;  %vm237_vm4 = vcmask 523264  }
  0x1b   :  { %162 = vmatpush.msra.mxu1 %v115_v7  ;;  %194 = vmatpush.msra.mxu2 %v169_v8  ;;  %v112_v15 = vld [vmem:[%s508_s1] sm:$0xff]  ;;  %s441_s1 = smov 64  }
  0x1c   :  { %228 = vmatpush.msra.mxu3 %v208_v9  ;;  %140 = vmatpush.msra.mxu0 %v119_v10 }
  0x1d   :  { %163 = vmatpush.msra.mxu1 %v114_v11 }
  0x1e   :  { %141 = vmatpush.msra.mxu0 %v118_v12 }
  0x1f   :  { %164 = vmatpush.msra.mxu1 %v113_v13  ;;  %260 = vmatmul.msk.f32.vlgmr.msra.gmra.mxu0 %vm122_vm1, %v117_v14 }
  0x20   :  { %261 = vmatmul.msk.f32.vlgmr.msra.gmra.mxu1 %vm122_vm1, %v112_v15 }
  0x8a   :  { %v108_v18 = vpop.permute.xlu0 %107 }
  0x8b   :  { %vm109_vm3 = vcmp.eq.s32.totalorder %v105_v17, %v108_v18 }
  0x8c   :  { %v259_v20 = vsel %vm109_vm3, 1.0, %v440_v19 }
  0x8d   :  { %263 = vmatmul.msk.f32.vlgmr.msra.gmra.mxu2 %vm171_vm2, %v259_v20  ;;  %265 = vmatmul.msk.f32.vlgmr.msra.gmra.mxu3 %vm171_vm2, %v259_v20 }
  0x9c   :  { %v143_v21 = vpop.f32.mrf.mxu0 }
  0x9d   :  { %v166_v22 = vpop.f32.mrf.mxu1 }
  0x9e   :  { %v167_v23 = vadd.f32 %v166_v22, %v143_v21 }
 0x110   :  { %v196_v24 = vpop.f32.mrf.mxu2  ;;  %v230_v25 = vpop.f32.mrf.mxu3 }
 0x111   :  { %v199_v26 = vadd.f32 %v196_v24, %v167_v23  ;;  %234 = vrot.lane.b32.xlu1 %v230_v25, %s441_s1 }
 0x113   :  { %278 = vtanh.f32 %v199_v26 }
 0x119   :  { %v279_v27 = vpop.eup %278 }
 0x11a   :  { %v201_v28 = vmul.f32 0.5, %v279_v27 }
 0x11c   :  { %v202_v29 = vadd.f32 0.5, %v201_v28 }
 0x11e   :  { %204 = vrot.lane.b32.xlu0 %v202_v29, %s441_s1 }
 0x183   :  { %v235_v32 = vpop.permute.xlu1 %234 }
 0x190   :  { %v205_v30 = vpop.permute.xlu0 %204 }
 0x191   :  { %v207_v31 = vmul.f32 %v279_v27, %v205_v30 }
 0x193   :  { %v238_v33 = vsel %vm237_vm4, %v207_v31, %v235_v32 }
 0x194   :  { %239 = vst [vmem:[#allocation11] sm:$0xff] %v238_v33 }
 0x195   :  { %250 = dma.vmem_to_hbm [thread:$0]  %s246_s27, 128, %s248_s30, [#allocation4]  }
 0x196   :  { %430 = dma.done.wait [#allocation4], 128  }
 0x197   :  { %431 = vsyncadd [#allocation4], 4294967168 }
 0x198   :  { %255 = vsyncpa [#allocation3], 1 }
 0x199   :  { %256 = vsyncpa [#allocation6], 1 }
 0x19a   :  { %257 = vsyncpa [#allocation9], 1 }
 0x19b   :  { %258 = vsyncpa [#allocation4], 1 }

</bundles_post_ra>
